<compile_context>
chip_gen: v5e
topology: v5e:2x2
jax: 0.10.0
libtpu: 0.0.40
codegen_flags: <defaults>
</compile_context>

<pallas_src>
import functools
from typing import List, NamedTuple

import jax
import jax.numpy as jnp
from jax.experimental import pallas as pl
from jax.experimental.pallas import tpu as pltpu


# ----------------------------- Pallas kernel -------------------------------


def _linear_kernel(x_ref, w_ref, b_ref, y_ref):
    # x_ref: (M, D_in) f32 | w_ref: (D_in, D_out) f32 | b_ref: (1, D_out) f32
    # y_ref: (M, D_out) f32
    acc = jnp.dot(x_ref[...], w_ref[...], preferred_element_type=jnp.float32)
    y_ref[...] = (acc + b_ref[...]).astype(y_ref.dtype)


def linear_pallas(x2d: jax.Array, w_t: jax.Array, b: jax.Array) -> jax.Array:
    """y = x2d @ w_t + b as a single ungridded pallas_call.

    Full-extent blocks (no grid), so the (8,128) divisibility requirement does
    not apply and there is no pipelining scaffolding. All operands are pinned
    to VMEM explicitly.
    """
    M, _ = x2d.shape
    d_out = w_t.shape[1]
    vmem = pl.BlockSpec(memory_space=pltpu.MemorySpace.VMEM)
    return pl.pallas_call(
        _linear_kernel,
        out_shape=jax.ShapeDtypeStruct((M, d_out), x2d.dtype),
        in_specs=[vmem, vmem, vmem],
        out_specs=vmem,
    )(x2d, w_t, b)


# --------------------------- Jitted fused forward ---------------------------


@functools.partial(jax.jit, static_argnames=("batch_size", "num_nodes"))
def _forward(x: jax.Array, w_t: jax.Array, b: jax.Array,
             batch_size: int, num_nodes: int):
    B, N, D_in = x.shape
    y2d = linear_pallas(x.reshape(B * N, D_in), w_t, b)
    y = y2d.reshape(B, N, -1)
    # Hint is a constant broadcast; produced here (fused by XLA), not in-kernel.
    ones = jnp.ones((batch_size, num_nodes), jnp.float32)
    return y, ones


# -------------------------- Feedback data plumbing --------------------------


class _DataPoint(NamedTuple):
    data: jax.Array


class _Features(NamedTuple):
    inputs: List[_DataPoint]


class _Feedback(NamedTuple):
    features: _Features
    outputs: List[_DataPoint]


class DummyModelPallas:
    """JAX/Pallas port of DummyModel(nn.Module)."""

    def __init__(self, input_dim: int, output_dim: int, key: jax.Array):
        kw, kb = jax.random.split(key)
        self.input_dim = input_dim
        self.output_dim = output_dim

        # nn.Linear stores weight as (output_dim, input_dim); we keep the
        # transposed (input_dim, output_dim) layout so the kernel does x @ W.
        bound = 1.0 / jnp.sqrt(jnp.float32(input_dim))
        self.weight_t = jax.random.uniform(
            kw, (input_dim, output_dim), jnp.float32, -bound, bound
        )
        self.bias = jax.random.uniform(
            kb, (1, output_dim), jnp.float32, -bound, bound
        )

    def __call__(self, feedback: _Feedback, algo_idx: int, repred: bool = False,
                 return_hints: bool = False, return_all_outputs: bool = False):
        batch_size = int(feedback.outputs[0].data.shape[0])
        num_nodes = int(feedback.outputs[0].data.shape[1])

        x = feedback.features.inputs[0].data  # (B, N, D_in)

        y, ones = _forward(x, self.weight_t, self.bias,
                           batch_size=batch_size, num_nodes=num_nodes)

        output_preds = {"dummy_output": y}
        hint_preds = [{"dummy_hint": ones},
                      {"dummy_hint": ones},
                      {"dummy_hint": ones}]
        return output_preds, hint_preds


# --------------------------------- main -------------------------------------


if __name__ == "__main__":
    key = jax.random.PRNGKey(0)
    k_param, k_in, k_out = jax.random.split(key, 3)

    batch = 2
    num_nodes = 8
    input_dim = 32
    output_dim = 16

    # feedback.features.inputs[0].data : (batch, num_nodes, input_dim)
    x = jax.random.normal(k_in, (batch, num_nodes, input_dim), jnp.float32)
    # feedback.outputs[0].data : (batch, num_nodes) — only its shape is used.
    out_data = jax.random.normal(k_out, (batch, num_nodes), jnp.float32)

    feedback = _Feedback(
        features=_Features(inputs=[_DataPoint(data=x)]),
        outputs=[_DataPoint(data=out_data)],
    )

    model = DummyModelPallas(input_dim, output_dim, k_param)
    output_preds, hint_preds = model(feedback, algo_idx=0)

    jax.block_until_ready(output_preds["dummy_output"])
    jax.block_until_ready(hint_preds[0]["dummy_hint"])

    # Sanity check against plain-JAX reference (linear + ones).
    ref = x.reshape(batch * num_nodes, input_dim) @ model.weight_t + model.bias
    ref = ref.reshape(batch, num_nodes, output_dim)
    assert output_preds["dummy_output"].shape == (batch, num_nodes, output_dim)
    assert jnp.allclose(output_preds["dummy_output"], ref, atol=1e-5)
    assert hint_preds[0]["dummy_hint"].shape == (batch, num_nodes)
    assert jnp.allclose(hint_preds[0]["dummy_hint"], 1.0)
    assert len(hint_preds) == 3

    print("KERNEL_OK")
</pallas_src>

<mosaic_0001>
module attributes {stable_mosaic.version = 11 : i64} {
  func.func @_linear_kernel(%arg0: memref<16x32xf32, #tpu.memory_space<vmem>>, %arg1: memref<32x16xf32, #tpu.memory_space<vmem>>, %arg2: memref<1x16xf32, #tpu.memory_space<vmem>>, %arg3: memref<16x16xf32, #tpu.memory_space<vmem>>) attributes {dimension_semantics = [], scalar_prefetch = 0 : i64, scratch_operands = 0 : i64, tpu.core_type = #tpu.core_type<tc>} {
    %c0 = arith.constant 0 : index
    %c0_0 = arith.constant 0 : index
    %0 = vector.load %arg0[%c0, %c0_0] : memref<16x32xf32, #tpu.memory_space<vmem>>, vector<16x32xf32>
    %c0_1 = arith.constant 0 : index
    %c0_2 = arith.constant 0 : index
    %1 = vector.load %arg1[%c0_1, %c0_2] : memref<32x16xf32, #tpu.memory_space<vmem>>, vector<32x16xf32>
    %cst = arith.constant dense<0.000000e+00> : vector<16x16xf32>
    %2 = tpu.matmul %0, %1, %cst {dimension_numbers = #tpu.dot_dimension_numbers<[1], [0], [0], [1], [0, 0, 1, 1], [], []>} : vector<16x32xf32>, vector<32x16xf32>, vector<16x16xf32> -> vector<16x16xf32>
    %c0_3 = arith.constant 0 : index
    %c0_4 = arith.constant 0 : index
    %3 = vector.load %arg2[%c0_3, %c0_4] : memref<1x16xf32, #tpu.memory_space<vmem>>, vector<1x16xf32>
    %4 = vector.broadcast %3 : vector<1x16xf32> to vector<16x16xf32>
    %5 = arith.addf %2, %4 : vector<16x16xf32>
    %c0_5 = arith.constant 0 : index
    %c0_6 = arith.constant 0 : index
    %6 = vector.load %arg3[%c0_5, %c0_6] : memref<16x16xf32, #tpu.memory_space<vmem>>, vector<16x16xf32>
    tpu.vector_store %arg3[%c0_5, %c0_6], %5 {strides = array<i32>} : memref<16x16xf32, #tpu.memory_space<vmem>>, vector<16x16xf32>,
    return
  }
}

</mosaic_0001>

<bundles_post_ra>
// kernel: _forward.1
= control target key start
LH: loop header
LB: loop body
LE: loop exit
PB: predicated region body
PF: predicated region fallthrough
CT: control target
= control target key end

     0   :  { %s159_s0 = inlined_call_operand.vmem [shape: f32[16,32], index: 0, kind: input, shape index: {}]   ;;  %s160_s1 = inlined_call_operand.vmem [shape: f32[32,16], index: 1, kind: input, shape index: {}]   ;;  %s161_s2 = inlined_call_operand.vmem [shape: f32[1,16], index: 2, kind: input, shape index: {}]   ;;  %s162_s3 = inlined_call_operand.hbm [shape: f32[16,16], index: 3, kind: output, shape index: {}]  }
   0x1   :  { %v20_v0 = vld [vmem:[%s160_s1 + $0x18] sm:$0xff]  ;;  %v19_v1 = vld [vmem:[%s160_s1 + $0x10] sm:$0xff]  ;;  %v18_v2 = vld [vmem:[%s160_s1 + $0x8] sm:$0xff] }
   0x2   :  { %44 = vmatpush.msra.mxu0 %v20_v0  ;;  %78 = vmatpush.msra.mxu1 %v20_v0 }
   0x3   :  { %8 = vsyncpa [#allocation3], 0  ;;  %v17_v3 = vld [vmem:[%s160_s1] sm:$0xff]  ;;  %vm25_vm0 = vcmask 261120   ;;  %v16_v5 = vld [vmem:[%s159_s0 + $0x8] sm:$0xff]  ;;  %s112_s1 = smov [#allocation2]  }
   0x4   :  { %45 = vmatpush.msra.mxu0 %v19_v1  ;;  %79 = vmatpush.msra.mxu1 %v19_v1  ;;  %v15_v4 = vld [vmem:[%s159_s0] sm:$0xff]  ;;  %s62_s26 = sshll.u32 %s112_s1, 4  ;;  %s64_s29 = sshll.u32 %s162_s3, 4  ;;  %vm55_vm1 = vcmask 130048   ;;  %s63_s26 = int_to_ptr.vmem [resolvable:$true] %s62_s26  ;;  %s65_s29 = int_to_ptr.hbm [resolvable:$true] %s64_s29 }
   0x5   :  { %v85_v6 = vld [vmem:[%s161_s2] ss:$0 sm:$0xff]  ;;  %s113_s0 = smov 128   ;;  %s114_s30 = smov 8  }
   0x6   :  { %46 = vmatpush.msra.mxu0 %v18_v2  ;;  %80 = vmatpush.msra.mxu1 %v18_v2 }
   0x8   :  { %47 = vmatpush.msra.mxu0 %v17_v3  ;;  %81 = vmatpush.msra.mxu1 %v17_v3 }
   0x9   :  { %76 = vmatmul.msk.f32.vlgmr.msra.gmra.mxu0 %vm25_vm0, %v15_v4  ;;  %77 = vmatmul.msk.f32.vlgmr.msra.gmra.mxu1 %vm25_vm0, %v16_v5 }
  0x86   :  { %v49_v7 = vpop.f32.mrf.mxu0  ;;  %v52_v8 = vpop.f32.mrf.mxu1 }
  0x87   :  { %v50_v9 = vadd.f32 %v85_v6, %v49_v7  ;;  %v53_v10 = vadd.f32 %v85_v6, %v52_v8 }
  0x89   :  { %56 = vst.msk [vmem:[#allocation2] sm:$0xff] %vm55_vm1, %v50_v9 }
  0x8a   :  { %57 = vst.msk [vmem:[#allocation2 + $0x8] sm:$0xff] %vm55_vm1, %v53_v10 }
  0x8b   :  { %70 = dma.vmem_to_hbm [thread:$0]  %s63_s26, 256, %s65_s29, [#allocation3], %s113_s0, %s113_s0, %s114_s30  }
  0x8c   :  { %110 = dma.done.wait [#allocation3], 256  }
  0x8d   :  { %111 = vsyncadd [#allocation3], 4294967040 }
  0x8e   :  { %75 = vsyncpa [#allocation3], 1 }

</bundles_post_ra>
